<compile_context>
chip_gen: v7x
topology: tpu7x:2x2x1
jax: 0.10.0
libtpu: 0.0.40
codegen_flags: <defaults>
</compile_context>

<pallas_src>
import functools
import math

import jax
import jax.numpy as jnp
from jax.experimental import pallas as pl
from jax.experimental.pallas import tpu as pltpu


def _tokenizer_kernel(xnum_ref, xcat_ref, off_ref, w_ref, emb_ref, out_ref, *,
                      d_num, n_cat):
    # xnum_ref: (TB, d_num) f32      xcat_ref: (TB, n_cat) i32
    # off_ref:  (1, n_cat)  i32      w_ref:    (d_num, d_token)
    # emb_ref:  (vocab, d_token)     out_ref:  (TB, (d_num + n_cat) * d_token)
    tb = out_ref.shape[0]
    vocab = emb_ref.shape[0]

    xnum = xnum_ref[...]                       # (TB, d_num)
    idx = xcat_ref[...] + off_ref[...]         # (TB, n_cat)  offsets fused in-kernel
    w = w_ref[...]                             # (d_num, d_token)
    emb = emb_ref[...]                         # (vocab, d_token)

    parts = []

    # --- numerical tokens: out[:, f, :] = x_num[:, f, None] * weight[f, :] (VPU) ---
    for f in range(d_num):
        xf = xnum[:, f:f + 1]                  # (TB, 1)       lane-broadcast source
        wf = w[f:f + 1, :]                     # (1, d_token)  sublane-broadcast source
        parts.append((xf * wf).astype(out_ref.dtype))           # (TB, d_token)

    # --- categorical tokens: embedding gather as one-hot @ table (MXU), per column ---
    iota_v = jax.lax.broadcasted_iota(jnp.int32, (tb, vocab), 1)   # hoisted out of loop
    for c in range(n_cat):
        ic = idx[:, c:c + 1]                   # (TB, 1)
        onehot = (iota_v == ic).astype(emb.dtype)                   # (TB, vocab)
        tok = jnp.dot(onehot, emb, preferred_element_type=jnp.float32)  # (TB, d_token)
        parts.append(tok.astype(out_ref.dtype))

    # Single lane-dense full-block store.
    out_ref[...] = jnp.concatenate(parts, axis=1)   # (TB, n_tok * d_token)


def tokenizer_forward(x_num, x_cat, weight, emb_table, category_offsets, *,
                      max_block_b=512):
    B, d_num = x_num.shape
    n_cat = x_cat.shape[1]
    d_token = weight.shape[1]
    vocab = emb_table.shape[0]
    n_tok = d_num + n_cat

    x_cat = x_cat.astype(jnp.int32)
    offsets2 = category_offsets.reshape(1, n_cat).astype(jnp.int32)

    # --- derive the batch tile TB from a conservative VMEM budget (v7x: 64 MiB total) ---
    out_itemsize = jnp.dtype(x_num.dtype).itemsize
    w_itemsize = jnp.dtype(weight.dtype).itemsize
    e_itemsize = jnp.dtype(emb_table.dtype).itemsize
    fixed = 2 * (d_num * d_token * w_itemsize + vocab * d_token * e_itemsize)
    per_row = (2 * (d_num + n_cat) * 4                 # double-buffered input tiles
               + 2 * n_tok * d_token * out_itemsize    # double-buffered output tile
               + 4 * n_tok * d_token * 4               # in-kernel token intermediates
               + 2 * vocab * 4)                        # iota + one-hot rows
    budget = 40 * 1024 * 1024
    tb_cap = int(min(max((budget - fixed) // per_row, 8), max_block_b))

    if B <= tb_cap:
        TB = B                                  # single block == full batch dim
    else:
        TB = max((tb_cap // 8) * 8, 8)          # sublane-aligned tile

    n_blocks = pl.cdiv(B, TB)
    B_pad = n_blocks * TB
    if B_pad != B:
        pad = B_pad - B
        x_num = jnp.pad(x_num, ((0, pad), (0, 0)))
        x_cat = jnp.pad(x_cat, ((0, pad), (0, 0)))   # index 0 + offset is a valid row; sliced away

    vmem_limit = int(min(max(fixed + TB * per_row + (4 << 20), 32 << 20), 48 << 20))

    cost = pl.CostEstimate(
        flops=int(B_pad) * (2 * n_cat * vocab * d_token + d_num * d_token),
        transcendentals=0,
        bytes_accessed=int(B_pad * (d_num + n_cat) * 4
                           + B_pad * n_tok * d_token * out_itemsize
                           + d_num * d_token * w_itemsize
                           + vocab * d_token * e_itemsize
                           + n_cat * 4))

    kernel = functools.partial(_tokenizer_kernel, d_num=d_num, n_cat=n_cat)

    out_flat = pl.pallas_call(
        kernel,
        out_shape=jax.ShapeDtypeStruct((B_pad, n_tok * d_token), x_num.dtype),
        grid=(n_blocks,),
        in_specs=[
            pl.BlockSpec((TB, d_num), lambda b: (b, 0)),
            pl.BlockSpec((TB, n_cat), lambda b: (b, 0)),
            pl.BlockSpec((1, n_cat), lambda b: (0, 0)),
            pl.BlockSpec((d_num, d_token), lambda b: (0, 0)),
            pl.BlockSpec((vocab, d_token), lambda b: (0, 0)),
        ],
        out_specs=pl.BlockSpec((TB, n_tok * d_token), lambda b: (b, 0)),
        compiler_params=pltpu.CompilerParams(
            dimension_semantics=("parallel",),
            vmem_limit_bytes=vmem_limit),
        cost_estimate=cost,
    )(x_num, x_cat, offsets2, weight, emb_table)

    # Row-major trailing-dim reshape: free metadata change in the wrapper.
    return out_flat[:B].reshape(B, n_tok, d_token)


def _kaiming_uniform(key, shape, fan_in):
    # nn.init.kaiming_uniform_(w, a=sqrt(5)) -> bound = 1/sqrt(fan_in)
    bound = 1.0 / math.sqrt(fan_in)
    return jax.random.uniform(key, shape, jnp.float32, minval=-bound, maxval=bound)


if __name__ == "__main__":
    # Small, module-consistent shapes.
    B = 2
    d_numerical = 4
    categories = [3, 5, 4]          # per-column cardinalities
    d_token = 32
    n_latent_tokens = 0             # asserted == 0 in the module

    n_cat = len(categories)
    vocab = sum(categories)

    key = jax.random.PRNGKey(0)
    k_w, k_e, k_x, k_c = jax.random.split(key, 4)

    weight = _kaiming_uniform(k_w, (d_numerical + n_latent_tokens, d_token), d_token)
    emb_table = _kaiming_uniform(k_e, (vocab, d_token), d_token)

    # category_offsets = cumsum([0] + categories[:-1])
    category_offsets = jnp.array(
        [0] + list(jnp.cumsum(jnp.array(categories[:-1])).tolist()), dtype=jnp.int32)

    def make_inputs(k, b):
        kx, kc = jax.random.split(k)
        xn = jax.random.normal(kx, (b, d_numerical), dtype=jnp.float32)
        xc = jnp.stack(
            [jax.random.randint(jax.random.fold_in(kc, j), (b,), 0, categories[j])
             for j in range(n_cat)], axis=1).astype(jnp.int32)
        return xn, xc

    def ref_fwd(xn, xc):
        ref_num = weight[None] * xn[:, :, None]
        ref_cat = emb_table[xc + category_offsets[None, :]]
        return jnp.concatenate([ref_num, ref_cat], axis=1)

    # Case 1: tiny batch (single full-extent block).
    x_num, x_cat = make_inputs(k_x, B)
    out = jax.block_until_ready(
        tokenizer_forward(x_num, x_cat, weight, emb_table, category_offsets))
    assert out.shape == (B, d_numerical + n_cat, d_token), out.shape
    assert jnp.allclose(out, ref_fwd(x_num, x_cat), atol=1e-5, rtol=1e-5), \
        "mismatch vs reference (case 1)"

    # Case 2: multi-block grid with batch padding (exercises the tiled path).
    B2 = 50
    x_num2, x_cat2 = make_inputs(k_c, B2)
    out2 = jax.block_until_ready(
        tokenizer_forward(x_num2, x_cat2, weight, emb_table, category_offsets,
                          max_block_b=16))
    assert out2.shape == (B2, d_numerical + n_cat, d_token), out2.shape
    assert jnp.allclose(out2, ref_fwd(x_num2, x_cat2), atol=1e-5, rtol=1e-5), \
        "mismatch vs reference (case 2)"

    print("KERNEL_OK")
</pallas_src>

<mosaic_0001>
module attributes {stable_mosaic.version = 11 : i64} {
  func.func @_tokenizer_kernel(%arg0: i32, %arg1: memref<2x4xf32, #tpu.memory_space<vmem>>, %arg2: memref<2x3xi32, #tpu.memory_space<vmem>>, %arg3: memref<1x3xi32, #tpu.memory_space<vmem>>, %arg4: memref<4x32xf32, #tpu.memory_space<vmem>>, %arg5: memref<12x32xf32, #tpu.memory_space<vmem>>, %arg6: memref<2x224xf32, #tpu.memory_space<vmem>>) attributes {dimension_semantics = [#tpu.dimension_semantics<parallel>], iteration_bounds = array<i64: 1>, scalar_prefetch = 0 : i64, scratch_operands = 0 : i64, tpu.core_type = #tpu.core_type<tc>, window_params = [{transform_indices = @transform_0, window_bounds = array<i64: 2, 4>}, {transform_indices = @transform_1, window_bounds = array<i64: 2, 3>}, {pipeline_mode = #tpu.pipeline_mode<synchronous>, transform_indices = @transform_2, window_bounds = array<i64: 1, 3>}, {pipeline_mode = #tpu.pipeline_mode<synchronous>, transform_indices = @transform_3, window_bounds = array<i64: 4, 32>}, {pipeline_mode = #tpu.pipeline_mode<synchronous>, transform_indices = @transform_4, window_bounds = array<i64: 12, 32>}, {transform_indices = @transform_5, window_bounds = array<i64: 2, 224>}]} {
    %c0 = arith.constant 0 : index
    %c0_0 = arith.constant 0 : index
    %0 = vector.load %arg1[%c0, %c0_0] : memref<2x4xf32, #tpu.memory_space<vmem>>, vector<2x4xf32>
    %c0_1 = arith.constant 0 : index
    %c0_2 = arith.constant 0 : index
    %1 = vector.load %arg2[%c0_1, %c0_2] : memref<2x3xi32, #tpu.memory_space<vmem>>, vector<2x3xi32>
    %c0_3 = arith.constant 0 : index
    %c0_4 = arith.constant 0 : index
    %2 = vector.load %arg3[%c0_3, %c0_4] : memref<1x3xi32, #tpu.memory_space<vmem>>, vector<1x3xi32>
    %3 = vector.broadcast %2 : vector<1x3xi32> to vector<2x3xi32>
    %4 = arith.addi %1, %3 : vector<2x3xi32>
    %c0_5 = arith.constant 0 : index
    %c0_6 = arith.constant 0 : index
    %5 = vector.load %arg4[%c0_5, %c0_6] : memref<4x32xf32, #tpu.memory_space<vmem>>, vector<4x32xf32>
    %c0_7 = arith.constant 0 : index
    %c0_8 = arith.constant 0 : index
    %6 = vector.load %arg5[%c0_7, %c0_8] : memref<12x32xf32, #tpu.memory_space<vmem>>, vector<12x32xf32>
    %7 = vector.extract_strided_slice %0 {offsets = [0, 0], sizes = [2, 1], strides = [1, 1]} : vector<2x4xf32> to vector<2x1xf32>
    %8 = vector.extract_strided_slice %5 {offsets = [0, 0], sizes = [1, 32], strides = [1, 1]} : vector<4x32xf32> to vector<1x32xf32>
    %9 = vector.broadcast %7 : vector<2x1xf32> to vector<2x32xf32>
    %10 = vector.broadcast %8 : vector<1x32xf32> to vector<2x32xf32>
    %11 = arith.mulf %9, %10 : vector<2x32xf32>
    %12 = vector.extract_strided_slice %0 {offsets = [0, 1], sizes = [2, 1], strides = [1, 1]} : vector<2x4xf32> to vector<2x1xf32>
    %13 = vector.extract_strided_slice %5 {offsets = [1, 0], sizes = [1, 32], strides = [1, 1]} : vector<4x32xf32> to vector<1x32xf32>
    %14 = vector.broadcast %12 : vector<2x1xf32> to vector<2x32xf32>
    %15 = vector.broadcast %13 : vector<1x32xf32> to vector<2x32xf32>
    %16 = arith.mulf %14, %15 : vector<2x32xf32>
    %17 = vector.extract_strided_slice %0 {offsets = [0, 2], sizes = [2, 1], strides = [1, 1]} : vector<2x4xf32> to vector<2x1xf32>
    %18 = vector.extract_strided_slice %5 {offsets = [2, 0], sizes = [1, 32], strides = [1, 1]} : vector<4x32xf32> to vector<1x32xf32>
    %19 = vector.broadcast %17 : vector<2x1xf32> to vector<2x32xf32>
    %20 = vector.broadcast %18 : vector<1x32xf32> to vector<2x32xf32>
    %21 = arith.mulf %19, %20 : vector<2x32xf32>
    %22 = vector.extract_strided_slice %0 {offsets = [0, 3], sizes = [2, 1], strides = [1, 1]} : vector<2x4xf32> to vector<2x1xf32>
    %23 = vector.extract_strided_slice %5 {offsets = [3, 0], sizes = [1, 32], strides = [1, 1]} : vector<4x32xf32> to vector<1x32xf32>
    %24 = vector.broadcast %22 : vector<2x1xf32> to vector<2x32xf32>
    %25 = vector.broadcast %23 : vector<1x32xf32> to vector<2x32xf32>
    %26 = arith.mulf %24, %25 : vector<2x32xf32>
    %27 = tpu.iota {dimensions = array<i32: 1>} : vector<2x12xi32>
    %28 = vector.extract_strided_slice %4 {offsets = [0, 0], sizes = [2, 1], strides = [1, 1]} : vector<2x3xi32> to vector<2x1xi32>
    %29 = vector.broadcast %28 : vector<2x1xi32> to vector<2x12xi32>
    %30 = arith.cmpi eq, %27, %29 : vector<2x12xi32>
    %31 = arith.extui %30 : vector<2x12xi1> to vector<2x12xi32>
    %32 = arith.sitofp %31 : vector<2x12xi32> to vector<2x12xf32>
    %cst = arith.constant dense<0.000000e+00> : vector<2x32xf32>
    %33 = tpu.matmul %32, %6, %cst {dimension_numbers = #tpu.dot_dimension_numbers<[1], [0], [0], [1], [0, 0, 1, 1], [], []>} : vector<2x12xf32>, vector<12x32xf32>, vector<2x32xf32> -> vector<2x32xf32>
    %34 = vector.extract_strided_slice %4 {offsets = [0, 1], sizes = [2, 1], strides = [1, 1]} : vector<2x3xi32> to vector<2x1xi32>
    %35 = vector.broadcast %34 : vector<2x1xi32> to vector<2x12xi32>
    %36 = arith.cmpi eq, %27, %35 : vector<2x12xi32>
    %37 = arith.extui %36 : vector<2x12xi1> to vector<2x12xi32>
    %38 = arith.sitofp %37 : vector<2x12xi32> to vector<2x12xf32>
    %cst_9 = arith.constant dense<0.000000e+00> : vector<2x32xf32>
    %39 = tpu.matmul %38, %6, %cst_9 {dimension_numbers = #tpu.dot_dimension_numbers<[1], [0], [0], [1], [0, 0, 1, 1], [], []>} : vector<2x12xf32>, vector<12x32xf32>, vector<2x32xf32> -> vector<2x32xf32>
    %40 = vector.extract_strided_slice %4 {offsets = [0, 2], sizes = [2, 1], strides = [1, 1]} : vector<2x3xi32> to vector<2x1xi32>
    %41 = vector.broadcast %40 : vector<2x1xi32> to vector<2x12xi32>
    %42 = arith.cmpi eq, %27, %41 : vector<2x12xi32>
    %43 = arith.extui %42 : vector<2x12xi1> to vector<2x12xi32>
    %44 = arith.sitofp %43 : vector<2x12xi32> to vector<2x12xf32>
    %cst_10 = arith.constant dense<0.000000e+00> : vector<2x32xf32>
    %45 = tpu.matmul %44, %6, %cst_10 {dimension_numbers = #tpu.dot_dimension_numbers<[1], [0], [0], [1], [0, 0, 1, 1], [], []>} : vector<2x12xf32>, vector<12x32xf32>, vector<2x32xf32> -> vector<2x32xf32>
    %46 = tpu.concatenate %11, %16, %21, %26, %33, %39, %45 in 1 : vector<2x32xf32>, vector<2x32xf32>, vector<2x32xf32>, vector<2x32xf32>, vector<2x32xf32>, vector<2x32xf32>, vector<2x32xf32> -> vector<2x224xf32>
    %c0_11 = arith.constant 0 : index
    %c0_12 = arith.constant 0 : index
    %47 = vector.load %arg6[%c0_11, %c0_12] : memref<2x224xf32, #tpu.memory_space<vmem>>, vector<2x224xf32>
    tpu.vector_store %arg6[%c0_11, %c0_12], %46 {strides = array<i32>} : memref<2x224xf32, #tpu.memory_space<vmem>>, vector<2x224xf32>,
    return
  }
  func.func @transform_0(%arg0: i32) -> (i32, i32) {
    %c0_i32 = arith.constant 0 : i32
    %c0_i32_0 = arith.constant 0 : i32
    return %arg0, %c0_i32 : i32, i32
  }
  func.func @transform_1(%arg0: i32) -> (i32, i32) {
    %c0_i32 = arith.constant 0 : i32
    %c0_i32_0 = arith.constant 0 : i32
    return %arg0, %c0_i32 : i32, i32
  }
  func.func @transform_2(%arg0: i32) -> (i32, i32) {
    %c0_i32 = arith.constant 0 : i32
    %c0_i32_0 = arith.constant 0 : i32
    %c0_i32_1 = arith.constant 0 : i32
    return %c0_i32, %c0_i32_0 : i32, i32
  }
  func.func @transform_3(%arg0: i32) -> (i32, i32) {
    %c0_i32 = arith.constant 0 : i32
    %c0_i32_0 = arith.constant 0 : i32
    %c0_i32_1 = arith.constant 0 : i32
    return %c0_i32, %c0_i32_0 : i32, i32
  }
  func.func @transform_4(%arg0: i32) -> (i32, i32) {
    %c0_i32 = arith.constant 0 : i32
    %c0_i32_0 = arith.constant 0 : i32
    %c0_i32_1 = arith.constant 0 : i32
    return %c0_i32, %c0_i32_0 : i32, i32
  }
  func.func @transform_5(%arg0: i32) -> (i32, i32) {
    %c0_i32 = arith.constant 0 : i32
    %c0_i32_0 = arith.constant 0 : i32
    return %arg0, %c0_i32 : i32, i32
  }
}

</mosaic_0001>

<bundles_post_ra>
// kernel: tpu_custom_call.1
= control target key start
LH: loop header
LB: loop body
LE: loop exit
PB: predicated region body
PF: predicated region fallthrough
CT: control target
= control target key end

     0   :  { %10 = vsyncpa [#allocation3], 0  ;;  %s662_s0 = inlined_call_operand.hbm [shape: f32[2,4], index: 0, kind: input, shape index: {}]   ;;  %s663_s1 = inlined_call_operand.vmem [shape: s32[2,3], index: 1, kind: input, shape index: {}]   ;;  %s664_s2 = inlined_call_operand.vmem [shape: s32[1,3], index: 2, kind: input, shape index: {}]   ;;  %s665_s3 = inlined_call_operand.vmem [shape: f32[4,32], index: 3, kind: input, shape index: {}]   ;;  %s666_s4 = inlined_call_operand.hbm [shape: f32[12,32], index: 4, kind: input, shape index: {}]   ;;  %s667_s5 = inlined_call_operand.hbm [shape: f32[2,224], index: 5, kind: output, shape index: {}]  }
   0x1   :  { %11 = vsyncpa [#allocation6], 0 }
   0x2   :  { %12 = vsyncpa [#allocation4], 0  ;;  %s547_s18 = smov [#allocation2]   ;;  %s548_s20 = smov [#allocation5]  }
   0x3   :  { %s19_s19 = sshll.u32 %s547_s18, 4  ;;  %s34_s21 = sshll.u32 %s548_s20, 4  ;;  %s20_s19 = int_to_ptr.vmem [resolvable:$true] %s19_s19  ;;  %s594_s21 = int_to_ptr.vmem [resolvable:$true] %s34_s21 }
   0x4   :  { %s475_s24 = scalar_lea.hbm %s662_s0, 32 }
   0x5   :  { %p476_p0 = scmp.ne.s32.totalorder %s662_s0, %s475_s24  ;;  %p479_p1 = scmp.lt.u32.totalorder %s475_s24, %s662_s0 }
   0x7   :  { %p481_p2 = pnand %p479_p1, %p476_p0 }
   0x9   :  { %484 = shalt.err (!%p481_p2)
}
   0xa   :  { %s485_s29 = scalar_lea.vmem %s20_s19, 32  ;;  %p490_p4 = scmp.lt.s32.totalorder %s20_s19, %s20_s19 }
   0xb   :  { %p486_p3 = scmp.ne.s32.totalorder %s20_s19, %s485_s29  ;;  %p491_p5 = scmp.lt.s32.totalorder %s485_s29, %s485_s29 }
   0xd   :  { %p492_p6 = por %p491_p5, %p490_p4 }
   0xf   :  { %p493_p7 = pnand %p492_p6, %p486_p3 }
  0x11   :  { %496 = shalt.err (!%p493_p7)
}
  0x12   :  { %22 = dma.hbm_to_vmem [thread:$0]  %s662_s0, 32, %s20_s19, [#allocation3]  }
  0x13   :  { %s497_s9 = scalar_lea.hbm %s666_s4, 256 }
  0x14   :  { %p498_p8 = scmp.ne.s32.totalorder %s666_s4, %s497_s9  ;;  %p501_p9 = scmp.lt.u32.totalorder %s497_s9, %s666_s4 }
  0x16   :  { %p503_p10 = pnand %p501_p9, %p498_p8 }
  0x18   :  { %506 = shalt.err (!%p503_p10)
}
  0x19   :  { %s507_s14 = scalar_lea.vmem %s594_s21, 256  ;;  %p512_p12 = scmp.lt.s32.totalorder %s594_s21, %s594_s21 }
  0x1a   :  { %p508_p11 = scmp.ne.s32.totalorder %s594_s21, %s507_s14  ;;  %p513_p13 = scmp.lt.s32.totalorder %s507_s14, %s507_s14 }
  0x1c   :  { %p514_p0 = por %p513_p13, %p512_p12 }
  0x1e   :  { %p515_p1 = pnand %p514_p0, %p508_p11 }
  0x20   :  { %518 = shalt.err (!%p515_p1)
}
  0x21   :  { %s549_s0 = smov 128   ;;  %s550_s15 = smov 8  }
  0x22   :  { %40 = dma.hbm_to_vmem [thread:$0]  %s666_s4, 256, %s594_s21, [#allocation6], %s549_s0, %s549_s0, %s550_s15  }
  0x23   :  { %541 = dma.done.wait [#allocation3], 32  }
  0x24   :  { %542 = vsyncadd [#allocation3], 4294967264 }
  0x25   :  { %543 = dma.done.wait [#allocation6], 256  }
  0x26   :  { %544 = vsyncadd [#allocation6], 4294967040  ;;  %v551_v0 = vmov 0   ;;  %v552_v1 = vmov 2   ;;  %v553_v2 = vmov 0.0|0.0   ;;  %vm107_vm0 = vcmask 1043456  }
  0x27   :  { %467 = vset.pattern.permute.xlu0 %v551_v0  ;;  %469 = vset.pattern.permute.xlu1 %v552_v1  ;;  %v48_v3 = vld [vmem:[%s663_s1] sm:$0x3]  ;;  %v56_v5 = vld [vmem:[#allocation5] sm:$0xff]  ;;  %v57_v7 = vld [vmem:[#allocation5 + $0x8] sm:$0xf]  ;;  %vm554_vm1 = vmmov 1   ;;  %v63_v14 = vlaneseq }
  0x28   :  { %438 = vmatprep.subr.bf16.mxu0 %v553_v2  ;;  %442 = vmatprep.subr.bf16.mxu1 %v553_v2  ;;  %v398_v4 = vld [vmem:[%s664_s2] ss:$0 sm:$0xff]  ;;  %vm631_vm2 = vmpackc.low %vm107_vm0, %vm554_vm1  ;;  %v439_v9 = vpack.c.bf16 %v57_v7, %v56_v5  ;;  %vm555_vm3 = vmmov 0   ;;  %v556_v10 = vmov 0.0   ;;  %v557_v11 = vmov 1   ;;  %s559_s4 = smov 64  }
  0x29   :  { %v54_v6 = vadd.s32 %v398_v4, %v48_v3  ;;  %421 = vmatprep.mubr.msk.f32.mxu0 %vm555_vm3, %v556_v10  ;;  %428 = vmatprep.mubr.msk.f32.mxu1 %vm555_vm3, %v556_v10  ;;  %v47_v12 = vld [vmem:[#allocation2] sm:$0x3]  ;;  %v558_v13 = vmov 3   ;;  %v96_v15 = vand.u32 127, %v63_v14  ;;  %vm103_vm4 = vcmask 97280   ;;  %s560_s21 = smov 32  }
  0x2a   :  { %441 = vmatpush3.bf16.msk.msra.mxu0 %vm631_vm2, %v439_v9  ;;  %445 = vmatpush3.bf16.msk.msra.mxu1 %vm631_vm2, %v439_v9  ;;  %v64_v18 = vshrl.u32 %v63_v14, 7  ;;  %v55_v24 = vld [vmem:[%s665_s3] sm:$0xf]  ;;  %s561_s23 = smov 96   ;;  %vm359_vm8 = vcmask 261120   ;;  %vm361_vm9 = vcmask 523264  }
  0x2b   :  { %98 = vperm.xlu0 %467, %v54_v6   ;;  %261 = vperm.xlu1 %469, %v54_v6   ;;  %v562_v48 = vmov 1983009808   ;;  %vm363_vm10 = vcmask 785408   ;;  %vm378_vm11 = vcmask 1041408   ;;  %vm379_vm12 = vcmask 781314   ;;  %s563_s3 = smov [#allocation7]  }
  0x2c   :  { %446 = vmatprep.subr.bf16.mxu0 %v553_v2  ;;  %v83_v22 = vsub.s32 2, %v64_v18  ;;  %v74_v29 = vsub.s32 1, %v64_v18  ;;  %v92_v30 = vsub.s32 3, %v64_v18  ;;  %v65_v42 = vsub.s32 0, %v64_v18  ;;  %s388_s24 = sshll.u32 %s563_s3, 4  ;;  %vm380_vm13 = vmor %vm379_vm12, %vm378_vm11  ;;  %s389_s24 = int_to_ptr.vmem [resolvable:$true] %s388_s24 }
  0x2d   :  { %v371_v49 = vunpack.c.l.s4 %v562_v48  ;;  %s519_s25 = scalar_lea.vmem %s389_s24, 64  ;;  %p524_p3 = scmp.lt.s32.totalorder %s389_s24, %s389_s24 }
  0x2e   :  { %v84_v26 = vrot.slane %v55_v24, %v83_v22  ;;  %v75_v31 = vrot.slane %v55_v24, %v74_v29  ;;  %v93_v32 = vrot.slane %v55_v24, %v92_v30  ;;  %v66_v44 = vrot.slane %v55_v24, %v65_v42  ;;  %p520_p2 = scmp.ne.s32.totalorder %s389_s24, %s519_s25  ;;  %p525_p4 = scmp.lt.s32.totalorder %s519_s25, %s519_s25 }
  0x2f   :  { %468 = vset.pattern.permute.xlu0 %v557_v11  ;;  %470 = vset.pattern.permute.xlu1 %v557_v11  ;;  %v372_v52 = vunpack.c.0.s8 %v371_v49 }
  0x30   :  { %182 = vperm.xlu0 %468, %v54_v6   ;;  %69 = vperm.xlu1 %470, %v47_v12   ;;  %p526_p5 = por %p525_p4, %p524_p3 }
  0x31   :  { %v375_v56 = vsub.s32 %v372_v52, %v64_v18 }
  0x32   :  { %p527_p6 = pnand %p526_p5, %p520_p2 }
  0x34   :  { %472 = vset.pattern.permute.xlu0 %v558_v13  ;;  %471 = vset.pattern.permute.xlu1 %v552_v1 }
  0x35   :  { %87 = vperm.xlu0 %472, %v47_v12   ;;  %78 = vperm.xlu1 %471, %v47_v12  }
  0x39   :  { %474 = vset.pattern.permute.xlu0 %v552_v1  ;;  %473 = vset.pattern.permute.xlu1 %v551_v0 }
  0x3a   :  { %60 = vperm.xlu1 %473, %v47_v12  }
  0xaa   :  { %v99_v16 = vpop.permute.xlu0 %98  ;;  %v262_v17 = vpop.permute.xlu1 %261 }
  0xab   :  { %vm100_vm5 = vcmp.eq.s32.totalorder %v96_v15, %v99_v16  ;;  %vm263_vm6 = vcmp.eq.s32.totalorder %v96_v15, %v262_v17 }
  0xac   :  { %v399_v19 = vsel %vm100_vm5, 1.0, %v556_v10  ;;  %v405_v20 = vsel %vm263_vm6, 1.0, %v556_v10 }
  0xad   :  { %422 = vmatmul.mubr.msk.f32.vlgmr.msra.gmra.mrb[0].mxu0 %vm103_vm4, %v399_v19 }
  0xae   :  { %449 = vmatpush3.bf16.msk.msra.mxu0 %vm631_vm2, %v439_v9  ;;  %435 = vmatprep.mubr.msk.f32.mxu0 %vm555_vm3, %v556_v10 }
  0xaf   :  { %v183_v21 = vpop.permute.xlu0 %182  ;;  %v70_v25 = vpop.permute.xlu1 %69 }
  0xb0   :  { %vm184_vm7 = vcmp.eq.s32.totalorder %v96_v15, %v183_v21  ;;  %v76_v34 = vmul.f32 %v75_v31, %v70_v25 }
  0xb1   :  { %v402_v23 = vsel %vm184_vm7, 1.0, %v556_v10  ;;  %436 = vmatmul.mubr.msk.f32.vlgmr.msra.gmra.mrb[2].mxu0 %vm103_vm4, %v405_v20 }
  0xb2   :  { %429 = vmatmul.mubr.msk.f32.vlgmr.msra.gmra.mrb[0].mxu1 %vm103_vm4, %v402_v23  ;;  %340 = vrot.lane.b32.xlu1 %v76_v34, %s560_s21 }
  0xb4   :  { %v79_v27 = vpop.permute.xlu1 %78  ;;  %v88_v33 = vpop.permute.xlu0 %87 }
  0xb5   :  { %v85_v28 = vmul.f32 %v84_v26, %v79_v27  ;;  %v94_v35 = vmul.f32 %v93_v32, %v88_v33 }
  0xb7   :  { %344 = vrot.lane.b32.xlu0 %v85_v28, %s559_s4 }
  0xb9   :  { %v61_v43 = vpop.permute.xlu1 %60 }
  0xba   :  { %v67_v45 = vmul.f32 %v66_v44, %v61_v43 }
  0xbb   :  { %348 = vrot.lane.b32.xlu0 %v94_v35, %s561_s23 }
 0x124   :  { %v341_v47 = vpop.permute.xlu1 %340 }
 0x125   :  { %v360_v50 = vsel %vm359_vm8, %v67_v45, %v341_v47 }
 0x129   :  { %v345_v46 = vpop.permute.xlu0 %344 }
 0x12a   :  { %v362_v54 = vsel %vm361_vm9, %v360_v50, %v345_v46 }
 0x12d   :  { %v349_v53 = vpop.permute.xlu0 %348 }
 0x12e   :  { %v364_v58 = vsel %vm363_vm10, %v362_v54, %v349_v53 }
 0x180   :  { %v177_v36 = vpop.f32.mrb[0].mxu0 }
 0x181   :  { %v423_v37 = vpop.f32.mrb[1].mxu0 }
 0x184   :  { %v335_v38 = vpop.f32.mrb[2].mxu0 }
 0x185   :  { %v256_v39 = vpop.f32.mrb[0].mxu1  ;;  %v437_v40 = vpop.f32.mrb[3].mxu0 }
 0x186   :  { %v430_v41 = vpop.f32.mrb[1].mxu1  ;;  %352 = vrot.lane.b32.xlu1 %v256_v39, %s560_s21 }
 0x18a   :  { %356 = vrot.lane.b32.xlu1 %v335_v38, %s559_s4 }
 0x1f8   :  { %v353_v51 = vpop.permute.xlu1 %352 }
 0x1f9   :  { %v365_v55 = vsel %vm359_vm8, %v177_v36, %v353_v51 }
 0x1fc   :  { %v357_v57 = vpop.permute.xlu1 %356 }
 0x1fd   :  { %v366_v59 = vsel %vm361_vm9, %v365_v55, %v357_v57 }
 0x1fe   :  { %v369_v60 = vcombine.low %v364_v58, %v366_v59 }
 0x200   :  { %v376_v61 = vrot.slane %v369_v60, %v375_v56 }
 0x202   :  { %381 = vst.msk [vmem:[#allocation7] sm:$0xf] %vm380_vm13, %v376_v61 }
 0x203   :  { %530 = shalt.err (!%p527_p6)
}
 0x204   :  { %s531_s28 = scalar_lea.hbm %s667_s5, 64 }
 0x205   :  { %p532_p7 = scmp.ne.s32.totalorder %s667_s5, %s531_s28  ;;  %p535_p8 = scmp.lt.u32.totalorder %s531_s28, %s667_s5 }
 0x207   :  { %p537_p9 = pnand %p535_p8, %p532_p7 }
 0x209   :  { %540 = shalt.err (!%p537_p9)
}
 0x20a   :  { %391 = dma.vmem_to_hbm [thread:$0]  %s389_s24, 64, %s667_s5, [#allocation4]  }
 0x20b   :  { %545 = dma.done.wait [#allocation4], 64  }
 0x20c   :  { %546 = vsyncadd [#allocation4], 4294967232 }
 0x20d   :  { %395 = vsyncpa [#allocation3], 1 }
 0x20e   :  { %396 = vsyncpa [#allocation6], 1 }
 0x20f   :  { %397 = vsyncpa [#allocation4], 1 }

</bundles_post_ra>
